<compile_context>
chip_gen: v7x
topology: tpu7x:2x2x1
jax: 0.10.0
libtpu: 0.0.40
codegen_flags: <defaults>
</compile_context>

<pallas_src>
import functools

import jax
import jax.numpy as jnp
from jax.experimental import pallas as pl
from jax.experimental.pallas import tpu as pltpu


def _round_up(n, m):
    return (n + m - 1) // m * m


def mlp_softmax_kernel(x_ref, w1_ref, b1_ref, w23_ref, b23_ref, o_ref):
    x = x_ref[...]

    # fc1 + ReLU:  relu(x @ W1 + b1)
    h1 = jnp.dot(x, w1_ref[...],
                 preferred_element_type=jnp.float32,
                 precision=jax.lax.Precision.DEFAULT) + b1_ref[...]
    h1 = jnp.maximum(h1, 0.0)

    # fc2 and fc3 fused:  h1 @ (W2 @ W3) + (b2 @ W3 + b3)
    # b23's padded lanes hold -1e30, so exp() underflows to exactly 0 there and the
    # softmax only "sees" the real output lanes -- no in-kernel masking needed.
    logits = jnp.dot(h1, w23_ref[...],
                     preferred_element_type=jnp.float32,
                     precision=jax.lax.Precision.DEFAULT) + b23_ref[...]

    # softmax over the feature dim — matches nn.Softmax() on 2-D input (dim=1)
    m = jnp.max(logits, axis=-1, keepdims=True)
    e = jnp.exp(logits - m)
    s = jnp.sum(e, axis=-1, keepdims=True)
    r = pl.reciprocal(s, approx=True)
    r = r * (2.0 - s * r)  # one Newton step -> ~f32 accuracy; EUP slot stays free
    o_ref[...] = e * r


def prepare_params(params):
    """One-time host-side prep: fuse fc2/fc3 and pad to MXU/lane-friendly shapes."""
    w1, b1, w2, b2, w3, b3 = params
    in_count = w1.shape[0]
    out_count = w3.shape[1]

    # fc2/fc3 fusion in full f32 (one-off cost, done once outside the hot path).
    hp = jax.lax.Precision.HIGHEST
    w23 = jnp.dot(w2, w3, precision=hp)            # (50, out_count)
    b23 = jnp.dot(b2, w3, precision=hp) + b3       # (1, out_count)

    KI = _round_up(in_count, 8)        # 32  -> 32
    H1 = _round_up(w1.shape[1], 128)   # 50  -> 128
    NO = _round_up(out_count, 128)     # 16  -> 128 (lane-dense output store)

    def pad2(a, r, c):
        return jnp.pad(a, ((0, r - a.shape[0]), (0, c - a.shape[1])))

    w1p = pad2(w1, KI, H1)
    b1p = pad2(b1, 1, H1)
    w23p = pad2(w23, H1, NO)
    # Padded output lanes get a very negative bias so they vanish under softmax.
    b23p = jnp.full((1, NO), -1e30, jnp.float32).at[:, :out_count].set(b23[0])

    return (w1p, b1p, w23p, b23p), out_count


@functools.partial(jax.jit, static_argnames=("out_count", "tb_max"))
def net_forward(x, w1p, b1p, w23p, b23p, *, out_count, tb_max=512):
    """Run the fused MLP+softmax kernel on pre-padded/fused params."""
    B, in_count = x.shape
    KI, H1 = w1p.shape
    NO = w23p.shape[1]

    # Batch tiling: multiple of 8 rows, <= tb_max, and aim for >= 2 grid steps so the
    # "parallel" grid axis actually shards across the two TensorCores on v7x.
    B_aligned = _round_up(B, 8)
    TB = min(tb_max, max(8, _round_up(pl.cdiv(B_aligned, 2), 8)))
    B_pad = _round_up(B, TB)
    xp = jnp.pad(x, ((0, B_pad - B), (0, KI - in_count)))

    grid = (B_pad // TB,)

    weight_bytes = 4 * (KI * H1 + H1 * NO + H1 + NO)
    cost_estimate = pl.CostEstimate(
        flops=2 * B_pad * (KI * H1 + H1 * NO),
        transcendentals=B_pad * NO,
        # x rows occupy a full 128-lane tile in the tiled HBM layout regardless of KI.
        bytes_accessed=4 * B_pad * (max(KI, 128) + NO) + weight_bytes,
    )

    out_padded = pl.pallas_call(
        mlp_softmax_kernel,
        out_shape=jax.ShapeDtypeStruct((B_pad, NO), jnp.float32),
        grid=grid,
        in_specs=[
            pl.BlockSpec((TB, KI), lambda i: (i, 0)),   # x: tiled over batch
            pl.BlockSpec((KI, H1), lambda i: (0, 0)),   # weights/biases: VMEM-resident
            pl.BlockSpec((1, H1), lambda i: (0, 0)),
            pl.BlockSpec((H1, NO), lambda i: (0, 0)),
            pl.BlockSpec((1, NO), lambda i: (0, 0)),
        ],
        out_specs=pl.BlockSpec((TB, NO), lambda i: (i, 0)),
        compiler_params=pltpu.CompilerParams(dimension_semantics=("parallel",)),
        cost_estimate=cost_estimate,
    )(xp, w1p, b1p, w23p, b23p)

    return out_padded[:B, :out_count]


def init_params(key, in_count, output_count):
    """Deterministic init mimicking PyTorch Linear's U(-1/sqrt(fan_in), +1/sqrt(fan_in))."""
    dims = [(in_count, 50), (50, 25), (25, output_count)]
    params = []
    for fan_in, fan_out in dims:
        kw, kb, key = jax.random.split(key, 3)
        bound = 1.0 / jnp.sqrt(jnp.float32(fan_in))
        # stored as (in, out) so the kernel does x @ W
        w = jax.random.uniform(kw, (fan_in, fan_out), jnp.float32, -bound, bound)
        b = jax.random.uniform(kb, (1, fan_out), jnp.float32, -bound, bound)
        params.extend([w, b])
    return tuple(params)


def _reference(x, params):
    """Pure-JAX reference of the PyTorch module (two-step fc2/fc3, full softmax)."""
    w1, b1, w2, b2, w3, b3 = params
    h1 = jnp.maximum(x @ w1 + b1, 0.0)
    h2 = h1 @ w2 + b2
    logits = h2 @ w3 + b3
    return jax.nn.softmax(logits, axis=-1)


if __name__ == "__main__":
    key = jax.random.PRNGKey(0)
    kx, kp = jax.random.split(key)

    batch = 8
    in_count = 32
    output_count = 16

    x = jax.random.normal(kx, (batch, in_count), jnp.float32)
    params = init_params(kp, in_count, output_count)

    # One-time host-side fusion + padding (hoisted out of the per-call path).
    (w1p, b1p, w23p, b23p), out_count = prepare_params(params)

    out = jax.block_until_ready(
        net_forward(x, w1p, b1p, w23p, b23p, out_count=out_count))

    assert out.shape == (batch, output_count)

    # Sanity: softmax rows sum to 1 (approx reciprocal + Newton is ~1e-7 relative).
    row_sums = jnp.sum(out, axis=-1)
    assert jnp.allclose(row_sums, jnp.ones_like(row_sums), atol=1e-5)

    # Sanity: matches the two-step reference. Tolerance relaxed (2e-3) because the
    # kernel uses the fused W2@W3, DEFAULT (bf16-pass) MXU precision, and an
    # approx reciprocal; semantics are unchanged.
    ref = _reference(x, params)
    assert jnp.allclose(out, ref, atol=2e-3)

    print("KERNEL_OK")
</pallas_src>

<mosaic_0001>
module attributes {stable_mosaic.version = 11 : i64} {
  func.func @mlp_softmax_kernel(%arg0: i32, %arg1: memref<8x32xf32, #tpu.memory_space<vmem>>, %arg2: memref<32x128xf32, #tpu.memory_space<vmem>>, %arg3: memref<1x128xf32, #tpu.memory_space<vmem>>, %arg4: memref<128x128xf32, #tpu.memory_space<vmem>>, %arg5: memref<1x128xf32, #tpu.memory_space<vmem>>, %arg6: memref<8x128xf32, #tpu.memory_space<vmem>>) attributes {dimension_semantics = [#tpu.dimension_semantics<parallel>], iteration_bounds = array<i64: 1>, scalar_prefetch = 0 : i64, scratch_operands = 0 : i64, tpu.core_type = #tpu.core_type<tc>, window_params = [{transform_indices = @transform_0, window_bounds = array<i64: 8, 32>}, {pipeline_mode = #tpu.pipeline_mode<synchronous>, transform_indices = @transform_1, window_bounds = array<i64: 32, 128>}, {pipeline_mode = #tpu.pipeline_mode<synchronous>, transform_indices = @transform_2, window_bounds = array<i64: 1, 128>}, {pipeline_mode = #tpu.pipeline_mode<synchronous>, transform_indices = @transform_3, window_bounds = array<i64: 128, 128>}, {pipeline_mode = #tpu.pipeline_mode<synchronous>, transform_indices = @transform_4, window_bounds = array<i64: 1, 128>}, {transform_indices = @transform_5, window_bounds = array<i64: 8, 128>}]} {
    %c0 = arith.constant 0 : index
    %c0_0 = arith.constant 0 : index
    %0 = vector.load %arg1[%c0, %c0_0] : memref<8x32xf32, #tpu.memory_space<vmem>>, vector<8x32xf32>
    %c0_1 = arith.constant 0 : index
    %c0_2 = arith.constant 0 : index
    %1 = vector.load %arg2[%c0_1, %c0_2] : memref<32x128xf32, #tpu.memory_space<vmem>>, vector<32x128xf32>
    %cst = arith.constant dense<0.000000e+00> : vector<8x128xf32>
    %2 = tpu.matmul %0, %1, %cst {dimension_numbers = #tpu.dot_dimension_numbers<[1], [0], [0], [1], [0, 0, 1, 1], [], []>} : vector<8x32xf32>, vector<32x128xf32>, vector<8x128xf32> -> vector<8x128xf32>
    %c0_3 = arith.constant 0 : index
    %c0_4 = arith.constant 0 : index
    %3 = vector.load %arg3[%c0_3, %c0_4] : memref<1x128xf32, #tpu.memory_space<vmem>>, vector<1x128xf32>
    %4 = vector.broadcast %3 : vector<1x128xf32> to vector<8x128xf32>
    %5 = arith.addf %2, %4 : vector<8x128xf32>
    %cst_5 = arith.constant 0.000000e+00 : f32
    %6 = vector.broadcast %cst_5 : f32 to vector<8x128xf32>
    %7 = arith.maximumf %5, %6 : vector<8x128xf32>
    %c0_6 = arith.constant 0 : index
    %c0_7 = arith.constant 0 : index
    %8 = vector.load %arg4[%c0_6, %c0_7] : memref<128x128xf32, #tpu.memory_space<vmem>>, vector<128x128xf32>
    %cst_8 = arith.constant dense<0.000000e+00> : vector<8x128xf32>
    %9 = tpu.matmul %7, %8, %cst_8 {dimension_numbers = #tpu.dot_dimension_numbers<[1], [0], [0], [1], [0, 0, 1, 1], [], []>} : vector<8x128xf32>, vector<128x128xf32>, vector<8x128xf32> -> vector<8x128xf32>
    %c0_9 = arith.constant 0 : index
    %c0_10 = arith.constant 0 : index
    %10 = vector.load %arg5[%c0_9, %c0_10] : memref<1x128xf32, #tpu.memory_space<vmem>>, vector<1x128xf32>
    %11 = vector.broadcast %10 : vector<1x128xf32> to vector<8x128xf32>
    %12 = arith.addf %9, %11 : vector<8x128xf32>
    %cst_11 = arith.constant dense<0xFF800000> : vector<8xf32>
    %13 = vector.multi_reduction <maximumf>, %12, %cst_11 [1] : vector<8x128xf32> to vector<8xf32>
    %14 = vector.shape_cast %13 : vector<8xf32> to vector<8x1xf32>
    %15 = vector.broadcast %14 : vector<8x1xf32> to vector<8x128xf32>
    %16 = arith.subf %12, %15 : vector<8x128xf32>
    %17 = math.exp %16 : vector<8x128xf32>
    %cst_12 = arith.constant dense<0.000000e+00> : vector<8xf32>
    %18 = vector.multi_reduction <add>, %17, %cst_12 [1] : vector<8x128xf32> to vector<8xf32>
    %19 = vector.shape_cast %18 : vector<8xf32> to vector<8x1xf32>
    %20 = tpu.reciprocal %19 {approx = true} : vector<8x1xf32> -> vector<8x1xf32>
    %21 = arith.mulf %19, %20 : vector<8x1xf32>
    %cst_13 = arith.constant 2.000000e+00 : f32
    %22 = vector.broadcast %cst_13 : f32 to vector<8x1xf32>
    %23 = arith.subf %22, %21 : vector<8x1xf32>
    %24 = arith.mulf %20, %23 : vector<8x1xf32>
    %25 = vector.broadcast %24 : vector<8x1xf32> to vector<8x128xf32>
    %26 = arith.mulf %17, %25 : vector<8x128xf32>
    %c0_14 = arith.constant 0 : index
    %c0_15 = arith.constant 0 : index
    %27 = vector.load %arg6[%c0_14, %c0_15] : memref<8x128xf32, #tpu.memory_space<vmem>>, vector<8x128xf32>
    tpu.vector_store %arg6[%c0_14, %c0_15], %26 {strides = array<i32>} : memref<8x128xf32, #tpu.memory_space<vmem>>, vector<8x128xf32>,
    return
  }
  func.func @transform_0(%arg0: i32) -> (i32, i32) {
    %c0_i32 = arith.constant 0 : i32
    %c0_i32_0 = arith.constant 0 : i32
    return %arg0, %c0_i32 : i32, i32
  }
  func.func @transform_1(%arg0: i32) -> (i32, i32) {
    %c0_i32 = arith.constant 0 : i32
    %c0_i32_0 = arith.constant 0 : i32
    %c0_i32_1 = arith.constant 0 : i32
    return %c0_i32, %c0_i32_0 : i32, i32
  }
  func.func @transform_2(%arg0: i32) -> (i32, i32) {
    %c0_i32 = arith.constant 0 : i32
    %c0_i32_0 = arith.constant 0 : i32
    %c0_i32_1 = arith.constant 0 : i32
    return %c0_i32, %c0_i32_0 : i32, i32
  }
  func.func @transform_3(%arg0: i32) -> (i32, i32) {
    %c0_i32 = arith.constant 0 : i32
    %c0_i32_0 = arith.constant 0 : i32
    %c0_i32_1 = arith.constant 0 : i32
    return %c0_i32, %c0_i32_0 : i32, i32
  }
  func.func @transform_4(%arg0: i32) -> (i32, i32) {
    %c0_i32 = arith.constant 0 : i32
    %c0_i32_0 = arith.constant 0 : i32
    %c0_i32_1 = arith.constant 0 : i32
    return %c0_i32, %c0_i32_0 : i32, i32
  }
  func.func @transform_5(%arg0: i32) -> (i32, i32) {
    %c0_i32 = arith.constant 0 : i32
    %c0_i32_0 = arith.constant 0 : i32
    return %arg0, %c0_i32 : i32, i32
  }
}

</mosaic_0001>

<bundles_post_ra>
// kernel: net_forward.1
= control target key start
LH: loop header
LB: loop body
LE: loop exit
PB: predicated region body
PF: predicated region fallthrough
CT: control target
= control target key end

     0   :  { %10 = vsyncpa [#allocation3], 0  ;;  %s576_s0 = inlined_call_operand.hbm [shape: f32[8,32], index: 0, kind: input, shape index: {}]   ;;  %s577_s1 = inlined_call_operand.hbm [shape: f32[32,128], index: 1, kind: input, shape index: {}]   ;;  %s578_s2 = inlined_call_operand.vmem [shape: f32[1,128], index: 2, kind: input, shape index: {}]   ;;  %s579_s3 = inlined_call_operand.hbm [shape: f32[128,128], index: 3, kind: input, shape index: {}]   ;;  %s580_s4 = inlined_call_operand.vmem [shape: f32[1,128], index: 4, kind: input, shape index: {}]   ;;  %s581_s5 = inlined_call_operand.hbm [shape: f32[8,128], index: 5, kind: output, shape index: {}]  }
   0x1   :  { %11 = vsyncpa [#allocation6], 0 }
   0x2   :  { %12 = vsyncpa [#allocation4], 0  ;;  %s477_s18 = smov [#allocation5]   ;;  %s383_s22 = scalar_lea.hbm %s577_s1, 512 }
   0x3   :  { %s28_s19 = sshll.u32 %s477_s18, 4  ;;  %p384_p0 = scmp.ne.s32.totalorder %s577_s1, %s383_s22  ;;  %s29_s19 = int_to_ptr.vmem [resolvable:$true] %s28_s19 }
   0x4   :  { %p387_p1 = scmp.lt.u32.totalorder %s383_s22, %s577_s1 }
   0x6   :  { %p389_p2 = pnand %p387_p1, %p384_p0 }
   0x8   :  { %392 = shalt.err (!%p389_p2)
}
   0x9   :  { %s393_s27 = scalar_lea.vmem %s29_s19, 512  ;;  %p398_p4 = scmp.lt.s32.totalorder %s29_s19, %s29_s19 }
   0xa   :  { %p394_p3 = scmp.ne.s32.totalorder %s29_s19, %s393_s27  ;;  %p399_p5 = scmp.lt.s32.totalorder %s393_s27, %s393_s27 }
   0xc   :  { %p400_p6 = por %p399_p5, %p398_p4 }
   0xe   :  { %p401_p7 = pnand %p400_p6, %p394_p3 }
  0x10   :  { %404 = shalt.err (!%p401_p7)
}
  0x11   :  { %s478_s28 = smov 128   ;;  %s479_s29 = smov 8  }
  0x12   :  { %34 = dma.hbm_to_vmem [thread:$0]  %s577_s1, 512, %s29_s19, [#allocation6], %s478_s28, %s478_s28, %s479_s29  }
  0x13   :  { %s480_s7 = smov [#allocation2]   ;;  %s481_s9 = smov [#allocation7]  }
  0x14   :  { %s19_s8 = sshll.u32 %s480_s7, 4  ;;  %s42_s10 = sshll.u32 %s481_s9, 4  ;;  %s20_s8 = int_to_ptr.vmem [resolvable:$true] %s19_s8  ;;  %s43_s10 = int_to_ptr.vmem [resolvable:$true] %s42_s10 }
  0x15   :  { %s405_s13 = scalar_lea.hbm %s576_s0, 128 }
  0x16   :  { %p406_p8 = scmp.ne.s32.totalorder %s576_s0, %s405_s13  ;;  %p409_p9 = scmp.lt.u32.totalorder %s405_s13, %s576_s0 }
  0x18   :  { %p411_p10 = pnand %p409_p9, %p406_p8 }
  0x1a   :  { %414 = shalt.err (!%p411_p10)
}
  0x1b   :  { %s415_s1 = scalar_lea.vmem %s20_s8, 128  ;;  %p420_p12 = scmp.lt.s32.totalorder %s20_s8, %s20_s8 }
  0x1c   :  { %p416_p11 = scmp.ne.s32.totalorder %s20_s8, %s415_s1  ;;  %p421_p13 = scmp.lt.s32.totalorder %s415_s1, %s415_s1 }
  0x1e   :  { %p422_p0 = por %p421_p13, %p420_p12 }
  0x20   :  { %p423_p1 = pnand %p422_p0, %p416_p11 }
  0x22   :  { %426 = shalt.err (!%p423_p1)
}
  0x23   :  { %22 = dma.hbm_to_vmem [thread:$0]  %s576_s0, 128, %s20_s8, [#allocation3]  }
  0x24   :  { %s427_s22 = scalar_lea.hbm %s579_s3, 2048 }
  0x25   :  { %p428_p2 = scmp.ne.s32.totalorder %s579_s3, %s427_s22  ;;  %p431_p3 = scmp.lt.u32.totalorder %s427_s22, %s579_s3 }
  0x27   :  { %p433_p4 = pnand %p431_p3, %p428_p2 }
  0x29   :  { %436 = shalt.err (!%p433_p4)
}
  0x2a   :  { %s437_s27 = scalar_lea.vmem %s43_s10, 2048  ;;  %p442_p6 = scmp.lt.s32.totalorder %s43_s10, %s43_s10 }
  0x2b   :  { %p438_p5 = scmp.ne.s32.totalorder %s43_s10, %s437_s27  ;;  %p443_p7 = scmp.lt.s32.totalorder %s437_s27, %s437_s27 }
  0x2d   :  { %p444_p8 = por %p443_p7, %p442_p6 }
  0x2f   :  { %p445_p9 = pnand %p444_p8, %p438_p5 }
  0x31   :  { %448 = shalt.err (!%p445_p9)
}
  0x32   :  { %48 = dma.hbm_to_vmem [thread:$0]  %s579_s3, 2048, %s43_s10, [#allocation6], %s478_s28, %s478_s28, %s479_s29  }
  0x33   :  { %471 = dma.done.wait [#allocation3], 128  }
  0x34   :  { %472 = vsyncadd [#allocation3], 4294967168 }
  0x35   :  { %473 = dma.done.wait [#allocation6], 2560  }
  0x36   :  { %474 = vsyncadd [#allocation6], 4294964736  ;;  %v482_v0 = vmov 0.0|0.0   ;;  %vm483_vm0 = vmmov 0   ;;  %v484_v1 = vmov 0.0   ;;  %v61_v2 = vld [vmem:[#allocation5] sm:$0xff] }
  0x37   :  { %340 = vmatprep.subr.bf16.mxu0 %v482_v0  ;;  %302 = vmatprep.mubr.msk.f32.mxu0 %vm483_vm0, %v484_v1  ;;  %v62_v3 = vld [vmem:[#allocation5 + $0x8] sm:$0xff]  ;;  %v63_v4 = vld [vmem:[#allocation5 + $0x10] sm:$0xff]  ;;  %v64_v6 = vld [vmem:[#allocation5 + $0x18] sm:$0xff]  ;;  %vm72_vm1 = vcmask 261120  }
  0x38   :  { %346 = vmatprep.subr.bf16.mxu1 %v482_v0  ;;  %337 = vmatprep.mubr.msk.f32.mxu1 %vm483_vm0, %v484_v1  ;;  %v341_v5 = vpack.c.bf16 %v62_v3, %v61_v2  ;;  %v147_v7 = vld [vmem:[#allocation7] sm:$0xff]  ;;  %v148_v8 = vld [vmem:[#allocation7 + $0x8] sm:$0xff]  ;;  %v149_v9 = vld [vmem:[#allocation7 + $0x10] sm:$0xff]  ;;  %v344_v11 = vpack.c.bf16 %v64_v6, %v63_v4 }
  0x39   :  { %v150_v10 = vld [vmem:[#allocation7 + $0x18] sm:$0xff]  ;;  %v347_v12 = vpack.c.bf16 %v148_v8, %v147_v7  ;;  %v151_v14 = vld [vmem:[#allocation7 + $0x20] sm:$0xff]  ;;  %v152_v15 = vld [vmem:[#allocation7 + $0x28] sm:$0xff] }
  0x3a   :  { %342 = vmatpush3.bf16.msra.mxu0 %v341_v5  ;;  %v350_v13 = vpack.c.bf16 %v150_v10, %v149_v9  ;;  %v60_v16 = vld [vmem:[#allocation2] sm:$0xff]  ;;  %v353_v17 = vpack.c.bf16 %v152_v15, %v151_v14  ;;  %v153_v18 = vld [vmem:[#allocation7 + $0x30] sm:$0xff]  ;;  %v155_v21 = vld [vmem:[#allocation7 + $0x40] sm:$0xff] }
  0x3b   :  { %343 = vmatprep.subr.bf16.mxu0 %v482_v0  ;;  %348 = vmatpush3.bf16.msra.mxu1 %v347_v12  ;;  %v154_v19 = vld [vmem:[#allocation7 + $0x38] sm:$0xff]  ;;  %v156_v22 = vld [vmem:[#allocation7 + $0x48] sm:$0xff]  ;;  %v157_v24 = vld [vmem:[#allocation7 + $0x50] sm:$0xff] }
  0x3c   :  { %349 = vmatprep.subr.bf16.mxu1 %v482_v0  ;;  %v356_v20 = vpack.c.bf16 %v154_v19, %v153_v18  ;;  %v359_v23 = vpack.c.bf16 %v156_v22, %v155_v21  ;;  %v158_v25 = vld [vmem:[#allocation7 + $0x58] sm:$0xff]  ;;  %v159_v27 = vld [vmem:[#allocation7 + $0x60] sm:$0xff]  ;;  %v160_v28 = vld [vmem:[#allocation7 + $0x68] sm:$0xff] }
  0x3d   :  { %v362_v26 = vpack.c.bf16 %v158_v25, %v157_v24  ;;  %v365_v29 = vpack.c.bf16 %v160_v28, %v159_v27  ;;  %v161_v30 = vld [vmem:[#allocation7 + $0x70] sm:$0xff]  ;;  %v162_v31 = vld [vmem:[#allocation7 + $0x78] sm:$0xff] }
  0x3e   :  { %345 = vmatpush3.bf16.msra.mxu0 %v344_v11  ;;  %v368_v32 = vpack.c.bf16 %v162_v31, %v161_v30  ;;  %v269_v33 = vld [vmem:[%s578_s2] ss:$0 sm:$0xff]  ;;  %s485_s2 = smov [#allocation8]  }
  0x3f   :  { %351 = vmatpush3.bf16.msra.mxu1 %v350_v13  ;;  %v271_v38 = vld [vmem:[%s580_s4] ss:$0 sm:$0xff]  ;;  %s259_s7 = sshll.u32 %s485_s2, 4  ;;  %s260_s7 = int_to_ptr.vmem [resolvable:$true] %s259_s7 }
  0x40   :  { %352 = vmatprep.subr.bf16.mxu1 %v482_v0  ;;  %s449_s4 = scalar_lea.vmem %s260_s7, 128  ;;  %p454_p11 = scmp.lt.s32.totalorder %s260_s7, %s260_s7 }
  0x41   :  { %303 = vmatmul.mubr.msk.f32.vlgmr.msra.gmra.mrb[0].mxu0 %vm72_vm1, %v60_v16  ;;  %p450_p10 = scmp.ne.s32.totalorder %s260_s7, %s449_s4  ;;  %p455_p12 = scmp.lt.s32.totalorder %s449_s4, %s449_s4 }
  0x43   :  { %354 = vmatpush3.bf16.msra.mxu1 %v353_v17  ;;  %p456_p13 = por %p455_p12, %p454_p11 }
  0x44   :  { %355 = vmatprep.subr.bf16.mxu1 %v482_v0 }
  0x45   :  { %p457_p0 = pnand %p456_p13, %p450_p10 }
  0x47   :  { %357 = vmatpush3.bf16.msra.mxu1 %v356_v20 }
  0x48   :  { %358 = vmatprep.subr.bf16.mxu1 %v482_v0 }
  0x4b   :  { %360 = vmatpush3.bf16.msra.mxu1 %v359_v23 }
  0x4c   :  { %361 = vmatprep.subr.bf16.mxu1 %v482_v0 }
  0x4f   :  { %363 = vmatpush3.bf16.msra.mxu1 %v362_v26 }
  0x50   :  { %364 = vmatprep.subr.bf16.mxu1 %v482_v0 }
  0x53   :  { %366 = vmatpush3.bf16.msra.mxu1 %v365_v29 }
  0x54   :  { %367 = vmatprep.subr.bf16.mxu1 %v482_v0 }
  0x57   :  { %369 = vmatpush3.bf16.msra.mxu1 %v368_v32 }
 0x114   :  { %v142_v34 = vpop.f32.mrb[0].mxu0 }
 0x115   :  { %v143_v35 = vadd.f32 %v269_v33, %v142_v34  ;;  %v304_v36 = vpop.f32.mrb[1].mxu0 }
 0x117   :  { %v146_v37 = vmax.f32 %v143_v35, 0.0 }
 0x119   :  { %338 = vmatmul.mubr.f32.vlgmr.msra.gmra.mrb[0].mxu1 %v146_v37 }
 0x1ec   :  { %v236_v39 = vpop.f32.mrb[0].mxu1 }
 0x1ed   :  { %v237_v40 = vadd.f32 %v271_v38, %v236_v39  ;;  %v339_v41 = vpop.f32.mrb[1].mxu1 }
 0x1ef   :  { %240 = vmax.xlane.f32.xlu0 %v237_v40 }
 0x27c   :  { %v241_v42 = vpop.xlane.xlu0 %240 }
 0x27d   :  { %v242_v43 = vsub.f32 %v237_v40, %v241_v42 }
 0x27f   :  { %v243_v44 = vmul.f32 1.442695, %v242_v43 }
 0x281   :  { %379 = vpow2.f32 %v243_v44 }
 0x28b   :  { %v380_v45 = vpop.eup %379 }
 0x28c   :  { %245 = vadd.xlane.f32.xlu0 %v380_v45 }
 0x319   :  { %v246_v46 = vpop.xlane.xlu0 %245 }
 0x31a   :  { %381 = vrcp.f32 %v246_v46 }
 0x324   :  { %v382_v47 = vpop.eup %381 }
 0x325   :  { %v248_v48 = vmul.f32 %v382_v47, %v246_v46 }
 0x327   :  { %v249_v49 = vsub.f32 2.0, %v248_v48 }
 0x329   :  { %v250_v50 = vmul.f32 %v382_v47, %v249_v49 }
 0x32b   :  { %v251_v51 = vmul.f32 %v380_v45, %v250_v50 }
 0x32d   :  { %252 = vst [vmem:[#allocation8] sm:$0xff] %v251_v51 }
 0x32e   :  { %460 = shalt.err (!%p457_p0)
}
 0x32f   :  { %s461_s10 = scalar_lea.hbm %s581_s5, 128 }
 0x330   :  { %p462_p1 = scmp.ne.s32.totalorder %s581_s5, %s461_s10  ;;  %p465_p2 = scmp.lt.u32.totalorder %s461_s10, %s581_s5 }
 0x332   :  { %p467_p3 = pnand %p465_p2, %p462_p1 }
 0x334   :  { %470 = shalt.err (!%p467_p3)
}
 0x335   :  { %262 = dma.vmem_to_hbm [thread:$0]  %s260_s7, 128, %s581_s5, [#allocation4]  }
 0x336   :  { %475 = dma.done.wait [#allocation4], 128  }
 0x337   :  { %476 = vsyncadd [#allocation4], 4294967168 }
 0x338   :  { %266 = vsyncpa [#allocation3], 1 }
 0x339   :  { %267 = vsyncpa [#allocation6], 1 }
 0x33a   :  { %268 = vsyncpa [#allocation4], 1 }

</bundles_post_ra>
